<compile_context>
chip_gen: v7x
topology: tpu7x:2x2x1
jax: 0.10.0
libtpu: 0.0.40
codegen_flags: <defaults>
</compile_context>

<pallas_src>
import jax
import jax.numpy as jnp
from jax.experimental import pallas as pl
from jax.experimental.pallas import tpu as pltpu


HIDDEN = 256

# Large row tiles amortize the ~0.35 us per-grid-step overhead.  At 2048 rows
# the padded, double-buffered VMEM footprint is ~6 MiB (see budget below) --
# far under the 32 MiB scoped default on v5e/v6e/v7x.
TILE_M_TARGET = 2048

# Padded VMEM bytes per row of tile (lane dim pads to 128 in VMEM):
#   x tile [tm, E] f32  -> 128*4 B/row,  act [tm, 1] i32 -> 128*4 B/row,
#   out tile [tm, E]    -> 128*4 B/row;  each double-buffered.
PADDED_BYTES_PER_ROW = 3 * 2 * 128 * 4
VMEM_BUDGET_BYTES = 24 * 1024 * 1024   # leave headroom inside the 32 MiB limit


def _round_up(x, m):
    return (x + m - 1) // m * m


def _choose_tile_m(m):
    """Balanced, 8-aligned row tiles; >=2 grid steps for v7x megacore."""
    n_tiles = pl.cdiv(m, TILE_M_TARGET)
    if m > 8:
        # v7x has 2 TensorCores; "parallel" grid axes shard across them.
        n_tiles = max(n_tiles, 2)
    tile_m = _round_up(pl.cdiv(m, n_tiles), 8)
    # VMEM guard (accounts for the 4x lane-padding of the E=32 / int32 blocks).
    max_tile = max((VMEM_BUDGET_BYTES // PADDED_BYTES_PER_ROW) // 8 * 8, 8)
    tile_m = min(tile_m, max_tile)
    n_tiles = pl.cdiv(m, tile_m)
    return tile_m, n_tiles


def backdyn_kernel(x_ref, act_ref, w1e_ref, w1a_ref, b1_ref, w2_ref, b2_ref,
                   out_ref):
    # x_ref:   [TM, E]  input dtype (cast to bf16 in VMEM before the MXU)
    # act_ref: [TM, 1]  i32
    # w1e_ref: [E, H]   bf16  (first-layer weights, embedding slice)
    # w1a_ref: [A, H]   bf16  (first-layer weights, one-hot slice)
    # b1_ref:  [1, H]   f32
    # w2_ref:  [H, E]   bf16
    # b2_ref:  [1, E]   f32
    # out_ref: [TM, E]  input dtype
    x = x_ref[...].astype(jnp.bfloat16)
    act = act_ref[...]                                   # [TM, 1] int32
    tm = x.shape[0]
    a = w1a_ref.shape[0]

    # one_hot(action, A) via lane-iota compare.  Out-of-range actions give an
    # all-zero row (matches jax.nn.one_hot / F.one_hot-on-valid-range).
    lane_ids = jax.lax.broadcasted_iota(jnp.int32, (tm, a), 1)
    one_hot = (lane_ids == act).astype(jnp.bfloat16)     # [TM, A]

    # concat([x, one_hot], -1) @ W1  ==  x @ W1[:E] + one_hot @ W1[E:]
    # TODO(synk): fuse into one K=E+A MXU pass once an in-VMEM lane pad of x
    # (32 -> 40 lanes) is guaranteed to lower; MXU is not the binding unit here.
    h = jnp.dot(x, w1e_ref[...], preferred_element_type=jnp.float32)
    h = h + jnp.dot(one_hot, w1a_ref[...],
                    preferred_element_type=jnp.float32)
    h = jnp.maximum(h + b1_ref[...], 0.0)                # f32 bias + ReLU
    h = h.astype(jnp.bfloat16)

    out = jnp.dot(h, w2_ref[...], preferred_element_type=jnp.float32)
    out_ref[...] = (out + b2_ref[...]).astype(out_ref.dtype)


def backdynamic_forward(next_state_embedding, action, params):
    """next_state_embedding: [T, B, E] float, action: [T, B] int -> [T, B, E]."""
    w1e, w1a, b1, w2, b2 = params
    T, B, E = next_state_embedding.shape
    A, H = w1a.shape
    M = T * B

    tile_m, n_tiles = _choose_tile_m(M)
    m_pad = tile_m * n_tiles

    # Output dtype follows input dtype: a bf16 producer halves x/out HBM
    # traffic with no wrapper-side cast pass; f32 in -> f32 out (torch parity).
    out_dtype = next_state_embedding.dtype

    x = next_state_embedding.reshape(M, E)        # keep native dtype
    act = action.reshape(M, 1).astype(jnp.int32)
    if m_pad != M:
        x = jnp.pad(x, ((0, m_pad - M), (0, 0)))
        act = jnp.pad(act, ((0, m_pad - M), (0, 0)))

    cost = pl.CostEstimate(
        flops=2 * m_pad * H * (E + A) + 2 * m_pad * H * E,
        transcendentals=0,
        bytes_accessed=(x.nbytes + act.nbytes + w1e.nbytes + w1a.nbytes
                        + b1.nbytes + w2.nbytes + b2.nbytes
                        + m_pad * E * jnp.dtype(out_dtype).itemsize),
    )

    out = pl.pallas_call(
        backdyn_kernel,
        out_shape=jax.ShapeDtypeStruct((m_pad, E), out_dtype),
        grid=(n_tiles,),
        in_specs=[
            pl.BlockSpec((tile_m, E), lambda i: (i, 0)),   # x tile
            # NOTE: the [tile_m, 1] i32 block lane-pads 128x in VMEM and its
            # DMA is sublane-strided; kept row-major because the in-kernel
            # one-hot compare needs the action along sublanes.  Fixed for free
            # by the feature-major layout (see module TODO).
            pl.BlockSpec((tile_m, 1), lambda i: (i, 0)),   # action tile
            pl.BlockSpec((E, H), lambda i: (0, 0)),        # W1 (embedding slice)
            pl.BlockSpec((A, H), lambda i: (0, 0)),        # W1 (one-hot slice)
            pl.BlockSpec((1, H), lambda i: (0, 0)),        # b1
            pl.BlockSpec((H, E), lambda i: (0, 0)),        # W2
            pl.BlockSpec((1, E), lambda i: (0, 0)),        # b2
        ],
        out_specs=pl.BlockSpec((tile_m, E), lambda i: (i, 0)),
        compiler_params=pltpu.CompilerParams(
            dimension_semantics=("parallel",),
            vmem_limit_bytes=32 * 1024 * 1024,
        ),
        cost_estimate=cost,
    )(x, act, w1e, w1a, b1, w2, b2)

    return out[:M].reshape(T, B, E)


def init_params(key, embedding_dim, num_actions, hidden=HIDDEN):
    k1, k2, k3, k4 = jax.random.split(key, 4)
    in_dim = embedding_dim + num_actions
    s1 = 1.0 / jnp.sqrt(in_dim)
    s2 = 1.0 / jnp.sqrt(hidden)
    w1 = jax.random.uniform(k1, (in_dim, hidden), jnp.float32, -s1, s1)
    b1 = jax.random.uniform(k2, (1, hidden), jnp.float32, -s1, s1)
    w2 = jax.random.uniform(k3, (hidden, embedding_dim), jnp.float32, -s2, s2)
    b2 = jax.random.uniform(k4, (1, embedding_dim), jnp.float32, -s2, s2)
    # Split W1 so the kernel never needs an explicit concat; MXU operands in
    # bf16 (fast MXU path + half the HBM weight traffic). Biases stay f32.
    w1e = w1[:embedding_dim].astype(jnp.bfloat16)    # [E, H]
    w1a = w1[embedding_dim:].astype(jnp.bfloat16)    # [A, H]
    w2 = w2.astype(jnp.bfloat16)                     # [H, E]
    return w1e, w1a, b1, w2, b2


def reference_forward(next_state_embedding, action, params, num_actions):
    """Pure-JAX reference mirroring the kernel's bf16-operand / f32-acc math."""
    w1e, w1a, b1, w2, b2 = params
    T, B, E = next_state_embedding.shape
    xb = next_state_embedding.reshape(-1, E).astype(jnp.bfloat16)
    oh = jax.nn.one_hot(action.reshape(-1), num_actions, dtype=jnp.bfloat16)
    h = (jnp.dot(xb, w1e, preferred_element_type=jnp.float32)
         + jnp.dot(oh, w1a, preferred_element_type=jnp.float32))
    h = jnp.maximum(h + b1, 0.0).astype(jnp.bfloat16)
    out = jnp.dot(h, w2, preferred_element_type=jnp.float32) + b2
    return out.astype(next_state_embedding.dtype).reshape(T, B, E)


if __name__ == "__main__":
    T, B = 8, 2           # seq, batch
    E = 32                # embedding_dim
    A = 8                 # num_actions

    key = jax.random.PRNGKey(0)
    kx, ka, kp = jax.random.split(key, 3)

    next_state_embedding = jax.random.normal(kx, (T, B, E), jnp.float32)
    action = jax.random.randint(ka, (T, B), 0, A, jnp.int32)
    params = init_params(kp, E, A)

    pred = backdynamic_forward(next_state_embedding, action, params)
    pred = jax.block_until_ready(pred)

    ref = reference_forward(next_state_embedding, action, params, A)
    assert pred.shape == (T, B, E)
    assert jnp.allclose(pred, ref, atol=1e-2, rtol=1e-2), float(
        jnp.max(jnp.abs(pred - ref)))

    print("KERNEL_OK")
</pallas_src>

<mosaic_0001>
module attributes {stable_mosaic.version = 11 : i64} {
  func.func @backdyn_kernel(%arg0: i32, %arg1: memref<8x32xf32, #tpu.memory_space<vmem>>, %arg2: memref<8x1xi32, #tpu.memory_space<vmem>>, %arg3: memref<32x256xbf16, #tpu.memory_space<vmem>>, %arg4: memref<8x256xbf16, #tpu.memory_space<vmem>>, %arg5: memref<1x256xf32, #tpu.memory_space<vmem>>, %arg6: memref<256x32xbf16, #tpu.memory_space<vmem>>, %arg7: memref<1x32xf32, #tpu.memory_space<vmem>>, %arg8: memref<8x32xf32, #tpu.memory_space<vmem>>) attributes {dimension_semantics = [#tpu.dimension_semantics<parallel>], iteration_bounds = array<i64: 2>, scalar_prefetch = 0 : i64, scratch_operands = 0 : i64, tpu.core_type = #tpu.core_type<tc>, window_params = [{transform_indices = @transform_0, window_bounds = array<i64: 8, 32>}, {transform_indices = @transform_1, window_bounds = array<i64: 8, 1>}, {pipeline_mode = #tpu.pipeline_mode<synchronous>, transform_indices = @transform_2, window_bounds = array<i64: 32, 256>}, {pipeline_mode = #tpu.pipeline_mode<synchronous>, transform_indices = @transform_3, window_bounds = array<i64: 8, 256>}, {pipeline_mode = #tpu.pipeline_mode<synchronous>, transform_indices = @transform_4, window_bounds = array<i64: 1, 256>}, {pipeline_mode = #tpu.pipeline_mode<synchronous>, transform_indices = @transform_5, window_bounds = array<i64: 256, 32>}, {pipeline_mode = #tpu.pipeline_mode<synchronous>, transform_indices = @transform_6, window_bounds = array<i64: 1, 32>}, {transform_indices = @transform_7, window_bounds = array<i64: 8, 32>}]} {
    %c0 = arith.constant 0 : index
    %c0_0 = arith.constant 0 : index
    %0 = vector.load %arg1[%c0, %c0_0] : memref<8x32xf32, #tpu.memory_space<vmem>>, vector<8x32xf32>
    %1 = arith.truncf %0 : vector<8x32xf32> to vector<8x32xbf16>
    %c0_1 = arith.constant 0 : index
    %c0_2 = arith.constant 0 : index
    %2 = vector.load %arg2[%c0_1, %c0_2] : memref<8x1xi32, #tpu.memory_space<vmem>>, vector<8x1xi32>
    %3 = tpu.iota {dimensions = array<i32: 1>} : vector<8x8xi32>
    %4 = vector.broadcast %2 : vector<8x1xi32> to vector<8x8xi32>
    %5 = arith.cmpi eq, %3, %4 : vector<8x8xi32>
    %6 = arith.extui %5 : vector<8x8xi1> to vector<8x8xi32>
    %7 = arith.sitofp %6 : vector<8x8xi32> to vector<8x8xf32>
    %8 = arith.truncf %7 : vector<8x8xf32> to vector<8x8xbf16>
    %c0_3 = arith.constant 0 : index
    %c0_4 = arith.constant 0 : index
    %9 = vector.load %arg3[%c0_3, %c0_4] : memref<32x256xbf16, #tpu.memory_space<vmem>>, vector<32x256xbf16>
    %cst = arith.constant dense<0.000000e+00> : vector<8x256xf32>
    %10 = tpu.matmul %1, %9, %cst {dimension_numbers = #tpu.dot_dimension_numbers<[1], [0], [0], [1], [0, 0, 1, 1], [], []>} : vector<8x32xbf16>, vector<32x256xbf16>, vector<8x256xf32> -> vector<8x256xf32>
    %c0_5 = arith.constant 0 : index
    %c0_6 = arith.constant 0 : index
    %11 = vector.load %arg4[%c0_5, %c0_6] : memref<8x256xbf16, #tpu.memory_space<vmem>>, vector<8x256xbf16>
    %cst_7 = arith.constant dense<0.000000e+00> : vector<8x256xf32>
    %12 = tpu.matmul %8, %11, %cst_7 {dimension_numbers = #tpu.dot_dimension_numbers<[1], [0], [0], [1], [0, 0, 1, 1], [], []>} : vector<8x8xbf16>, vector<8x256xbf16>, vector<8x256xf32> -> vector<8x256xf32>
    %13 = arith.addf %10, %12 : vector<8x256xf32>
    %c0_8 = arith.constant 0 : index
    %c0_9 = arith.constant 0 : index
    %14 = vector.load %arg5[%c0_8, %c0_9] : memref<1x256xf32, #tpu.memory_space<vmem>>, vector<1x256xf32>
    %15 = vector.broadcast %14 : vector<1x256xf32> to vector<8x256xf32>
    %16 = arith.addf %13, %15 : vector<8x256xf32>
    %cst_10 = arith.constant 0.000000e+00 : f32
    %17 = vector.broadcast %cst_10 : f32 to vector<8x256xf32>
    %18 = arith.maximumf %16, %17 : vector<8x256xf32>
    %19 = arith.truncf %18 : vector<8x256xf32> to vector<8x256xbf16>
    %c0_11 = arith.constant 0 : index
    %c0_12 = arith.constant 0 : index
    %20 = vector.load %arg6[%c0_11, %c0_12] : memref<256x32xbf16, #tpu.memory_space<vmem>>, vector<256x32xbf16>
    %cst_13 = arith.constant dense<0.000000e+00> : vector<8x32xf32>
    %21 = tpu.matmul %19, %20, %cst_13 {dimension_numbers = #tpu.dot_dimension_numbers<[1], [0], [0], [1], [0, 0, 1, 1], [], []>} : vector<8x256xbf16>, vector<256x32xbf16>, vector<8x32xf32> -> vector<8x32xf32>
    %c0_14 = arith.constant 0 : index
    %c0_15 = arith.constant 0 : index
    %22 = vector.load %arg7[%c0_14, %c0_15] : memref<1x32xf32, #tpu.memory_space<vmem>>, vector<1x32xf32>
    %23 = vector.broadcast %22 : vector<1x32xf32> to vector<8x32xf32>
    %24 = arith.addf %21, %23 : vector<8x32xf32>
    %c0_16 = arith.constant 0 : index
    %c0_17 = arith.constant 0 : index
    %25 = vector.load %arg8[%c0_16, %c0_17] : memref<8x32xf32, #tpu.memory_space<vmem>>, vector<8x32xf32>
    tpu.vector_store %arg8[%c0_16, %c0_17], %24 {strides = array<i32>} : memref<8x32xf32, #tpu.memory_space<vmem>>, vector<8x32xf32>,
    return
  }
  func.func @transform_0(%arg0: i32) -> (i32, i32) {
    %c0_i32 = arith.constant 0 : i32
    %c0_i32_0 = arith.constant 0 : i32
    return %arg0, %c0_i32 : i32, i32
  }
  func.func @transform_1(%arg0: i32) -> (i32, i32) {
    %c0_i32 = arith.constant 0 : i32
    %c0_i32_0 = arith.constant 0 : i32
    return %arg0, %c0_i32 : i32, i32
  }
  func.func @transform_2(%arg0: i32) -> (i32, i32) {
    %c0_i32 = arith.constant 0 : i32
    %c0_i32_0 = arith.constant 0 : i32
    %c0_i32_1 = arith.constant 0 : i32
    return %c0_i32, %c0_i32_0 : i32, i32
  }
  func.func @transform_3(%arg0: i32) -> (i32, i32) {
    %c0_i32 = arith.constant 0 : i32
    %c0_i32_0 = arith.constant 0 : i32
    %c0_i32_1 = arith.constant 0 : i32
    return %c0_i32, %c0_i32_0 : i32, i32
  }
  func.func @transform_4(%arg0: i32) -> (i32, i32) {
    %c0_i32 = arith.constant 0 : i32
    %c0_i32_0 = arith.constant 0 : i32
    %c0_i32_1 = arith.constant 0 : i32
    return %c0_i32, %c0_i32_0 : i32, i32
  }
  func.func @transform_5(%arg0: i32) -> (i32, i32) {
    %c0_i32 = arith.constant 0 : i32
    %c0_i32_0 = arith.constant 0 : i32
    %c0_i32_1 = arith.constant 0 : i32
    return %c0_i32, %c0_i32_0 : i32, i32
  }
  func.func @transform_6(%arg0: i32) -> (i32, i32) {
    %c0_i32 = arith.constant 0 : i32
    %c0_i32_0 = arith.constant 0 : i32
    %c0_i32_1 = arith.constant 0 : i32
    return %c0_i32, %c0_i32_0 : i32, i32
  }
  func.func @transform_7(%arg0: i32) -> (i32, i32) {
    %c0_i32 = arith.constant 0 : i32
    %c0_i32_0 = arith.constant 0 : i32
    return %arg0, %c0_i32 : i32, i32
  }
}

</mosaic_0001>

<bundles_post_ra>
// kernel: tpu_custom_call.1
= control target key start
LH: loop header
LB: loop body
LE: loop exit
PB: predicated region body
PF: predicated region fallthrough
CT: control target
= control target key end

     0   :  { %12 = vsyncpa [#allocation3], 0  ;;  %s1124_s0 = inlined_call_operand.vmem [shape: f32[16,32], index: 0, kind: input, shape index: {}]   ;;  %s1125_s1 = inlined_call_operand.vmem [shape: s32[16,1], index: 1, kind: input, shape index: {}]   ;;  %s1126_s2 = inlined_call_operand.vmem [shape: bf16[32,256], index: 2, kind: input, shape index: {}]   ;;  %s1127_s3 = inlined_call_operand.vmem [shape: bf16[8,256], index: 3, kind: input, shape index: {}]   ;;  %s1128_s4 = inlined_call_operand.vmem [shape: f32[1,256], index: 4, kind: input, shape index: {}]   ;;  %s1129_s5 = inlined_call_operand.vmem [shape: bf16[256,32], index: 5, kind: input, shape index: {}]   ;;  %s1130_s6 = inlined_call_operand.vmem [shape: f32[1,32], index: 6, kind: input, shape index: {}]   ;;  %s1131_s7 = inlined_call_operand.hbm [shape: f32[16,32], index: 7, kind: output, shape index: {}]  }
   0x1   :  { %14 = vsyncpa [#allocation3 + $0x1], 0  ;;  %s943_s24 = smov 0   ;;  %s945_s25 = smov 0  }
   0x2   :  { %s947_s26 = smov 0   ;;  %s949_s27 = smov 0  }
   0x3 LB: > { %s964_s28 = sadd.s32 4294967295, %s898_s27   ;;  %s710_s29 = sadd.s32 4294967294, %s898_s27   ;;  %s898_s27 = sphi %s949_s27, %s1137_s27   ;;  %s894_s26 = sphi %s947_s26, %s1136_s26   ;;  %s890_s25 = sphi %s945_s25, %s1135_s25   ;;  %s886_s24 = sphi %s943_s24, %s1134_s24  }
   0x4   : > { %s968_s30 = sadd.s32 1, %s898_s27   ;;  %s184_s8 = sadd.s32 1, %s894_s26 }
   0x5   : > { %s181_s9 = ssub.s32 %s898_s27, %s968_s30  ;;  %p194_p0 = scmp.ne.s32.totalorder %s894_s26, %s890_s25 }
   0x6   : > { %p182_p1 = scmp.eq.s32.totalorder %s181_s9, 0  ;;  %p195_p2 = scmp.eq.s32.totalorder %s964_s28, 1 }
   0x7   : > { %p200_p3 = scmp.ne.s32.totalorder %s890_s25, %s886_s24  ;;  %p201_p4 = scmp.eq.s32.totalorder %s710_s29, 1 }
   0x8   : > { %s979_s10 = scalar_select %p182_p1, %s894_s26, %s184_s8  }
   0x9   : > { %p981_p5 = por %p195_p2, %p194_p0  ;;  %p985_p6 = por %p201_p4, %p200_p3 }
   0xa   : > { %p713_p7 = scmp.ge.s32.totalorder %s898_s27, 1  ;;  %p248_p8 = scmp.lt.s32.totalorder %s898_s27, 3 }
   0xc   : > { %p249_p9 = pnand %p713_p7, %p248_p8 }
   0xd   : > { %p283_p10 = scmp.lt.s32.totalorder (!%p249_p9), %s964_s28, 1  ;;  %v308_v0 = vld [vmem:[%s1127_s3] sm:$0xff] (!%p249_p9)  ;;  %vm318_vm0 = vcmask (!%p249_p9), 1043456   ;;  %v900_v1 = vmov (!%p249_p9), 0   ;;  %v822_v9 = vld [vmem:[%s1129_s5 + $0x48] sm:$0xff] (!%p249_p9)   ;;  %v824_v11 = vld [vmem:[%s1129_s5 + $0x50] sm:$0xff] (!%p249_p9)   ;;  %v295_v14 = vlaneseq (!%p249_p9) }
   0xe   : > { %252 = sbr.rel (%p249_p9) target bundleno = 619 (0x26b), region = 48  ;;  %811 = vset.pattern.permute.xlu0 (!%p249_p9), %v900_v1  ;;  %v719_v2 = vcombine.high (!%p249_p9), %v308_v0, %v308_v0  ;;  %357 = vmatprep.mubr.bf16.mxu1 (!%p249_p9), %v900_v1  ;;  %v718_v3 = vcombine.low (!%p249_p9), %v308_v0, %v308_v0  ;;  %v816_v6 = vld [vmem:[%s1126_s2 + $0x4] ss:$8 sps:$4 sm:$0xff] (!%p249_p9)   ;;  %v825_v12 = vld [vmem:[%s1129_s5 + $0x10] sm:$0xff] (!%p249_p9)   ;;  %v826_v13 = vld [vmem:[%s1129_s5 + $0x58] sm:$0xff] (!%p249_p9)   ;;  %v901_v17 = vmov (!%p249_p9), 0.0  }
   0xf   : > { %v820_v7 = vld [vmem:[%s1129_s5 + $0x40] sm:$0xff] (!%p249_p9)   ;;  %v823_v10 = vld [vmem:[%s1129_s5 + $0x8] sm:$0xff] (!%p249_p9)   ;;  %v296_v15 = vand.u32 (!%p249_p9), 127, %v295_v14  ;;  %vm314_vm2 = vcmask (!%p249_p9), 64512   ;;  %v819_v21 = vld [vmem:[%s1126_s2 + $0x14] ss:$8 sps:$4 sm:$0xff] (!%p249_p9)  }
  0x10   : > { %720 = vmatprep.subr.msk.bf16.mxu1 (!%p249_p9), %vm318_vm0, %v719_v2  ;;  %v320_v5 = vsel (!%p249_p9), %vm318_vm0, %v718_v3, 0  ;;  %v821_v8 = vld [vmem:[%s1129_s5] sm:$0xff] (!%p249_p9)   ;;  %748 = vmatprep.subr.bf16.mxu0 (!%p249_p9), %v820_v7  ;;  %v817_v23 = vld [vmem:[%s1126_s2 + $0x10] ss:$8 sps:$4 sm:$0xff] (!%p249_p9)   ;;  %vm386_vm3 = vcmask (!%p249_p9), 261120   ;;  %v830_v28 = vld [vmem:[%s1129_s5 + $0x68] sm:$0xff] (!%p249_p9)  }
  0x11   : > { %326 = vmatpush1.bf16.msra.mxu1 (!%p249_p9), %v320_v5  ;;  %749 = vmatpush3.bf16.msra.mxu0 (!%p249_p9), %v821_v8  ;;  %v814_v19 = vld [vmem:[%s1126_s2] ss:$8 sps:$4 sm:$0xff] (!%p249_p9)   ;;  %v827_v25 = vld [vmem:[%s1129_s5 + $0x18] sm:$0xff] (!%p249_p9)   ;;  %v832_v30 = vld [vmem:[%s1129_s5 + $0x70] sm:$0xff] (!%p249_p9)   ;;  %v434_v34 = vshrl.u32 (!%p249_p9), %v295_v14, 7  ;;  %s280_s8 = sand.u32 (!%p249_p9), 1, %s890_s25  }
  0x12   : > { %390 = vmatprep.subr.bf16.mxu1 (!%p249_p9), %v816_v6  ;;  %750 = vmatprep.subr.bf16.mxu0 (!%p249_p9), %v822_v9  ;;  %v828_v26 = vld [vmem:[%s1129_s5 + $0x60] sm:$0xff] (!%p249_p9)   ;;  %v831_v29 = vld [vmem:[%s1129_s5 + $0x28] sm:$0xff] (!%p249_p9)   ;;  %v833_v31 = vld [vmem:[%s1129_s5 + $0x30] sm:$0xff] (!%p249_p9)   ;;  %s714_s9 = sshll.u32 (!%p249_p9), %s280_s8, 3  ;;  %s745_s17 = sshll.u32 (!%p249_p9), %s964_s28, 7 }
  0x13   : > { %v829_v27 = vld [vmem:[%s1129_s5 + $0x20] sm:$0xff] (!%p249_p9)   ;;  %v834_v32 = vld [vmem:[%s1129_s5 + $0x78] sm:$0xff] (!%p249_p9)   ;;  %v435_v39 = vsub.s32 (!%p249_p9), 0, %v434_v34  ;;  %v439_v41 = vsub.s32 (!%p249_p9), 1, %v434_v34  ;;  %s282_s18 = scalar_lea.vmem (!%p249_p9), [#allocation2], %s714_s9  ;;  %s626_s21 = scalar_lea.sflag (!%p249_p9), [#allocation3], %s280_s8 }
  0x14   : > { %v835_v33 = vld [vmem:[%s1129_s5 + $0x38] sm:$0xff] (!%p249_p9)   ;;  %v431_v40 = vld [vmem:[%s1128_s4] sm:$0x3] (!%p249_p9)  ;;  %s902_s22 = smov (!%p249_p9), [#allocation2]  }
  0x15   : > { %s996_s15 = scalar_select %p283_p10, %s964_s28, 1  ;;  %751 = vmatpush3.bf16.msra.mxu0 %v823_v10  ;;  %v436_v42 = vrot.slane %v431_v40, %v435_v39  ;;  %v440_v44 = vrot.slane %v431_v40, %v439_v41  ;;  %v727_v57 = vld [vmem:[%s1130_s6] ss:$0 sm:$0xff] }
  0x16   : > { %752 = vmatprep.subr.bf16.mxu0 %v824_v11  ;;  %s840_s23 = sshll.u32 %s902_s22, 4  ;;  %s841_s23 = int_to_ptr.vmem [resolvable:$false] %s840_s23 }
  0x17   : > { %s715_s16 = sshll.u32 %s996_s15, 3  ;;  %s842_s29 = scalar_lea.vmem %s841_s23, 256 }
  0x18   : > { %s290_s19 = scalar_lea.vmem %s1125_s1, %s715_s16  ;;  %s286_s14 = scalar_lea.vmem %s1124_s0, %s715_s16 }
  0x19   : > { %v294_v4 = vld [vmem:[%s290_s19] sm:$0xff]  ;;  %753 = vmatpush3.bf16.msra.mxu0 %v825_v12  ;;  %s639_s19 = sshll.u32 %s282_s18, 4  ;;  %s1081_s16 = scalar_lea.hbm %s1131_s7, %s745_s17  ;;  %s1083_s19 = int_to_ptr.vmem [resolvable:$true] %s639_s19 }
  0x1a   : > { %298 = vperm.xlu0 %811, %v294_v4   ;;  %754 = vmatprep.subr.bf16.mxu0 %v826_v13  ;;  %v292_v22 = vld [vmem:[%s286_s14] sm:$0xff]  ;;  %s836_s28 = scalar_lea.vmem %s1083_s19, 128  ;;  %p843_p0 = scmp.lt.s32.totalorder %s1083_s19, %s841_s23 }
  0x1b   : > { %v293_v24 = vpack.c.bf16 %v292_v22, %v292_v22  ;;  %p837_p11 = scmp.ne.s32.totalorder %s1083_s19, %s836_s28  ;;  %p844_p1 = scmp.lt.s32.totalorder %s842_s29, %s836_s28 }
  0x1d   : > { %755 = vmatpush3.bf16.msra.mxu0 %v827_v25  ;;  %p838_p12 = pnand %p837_p11, %p981_p5  ;;  %p845_p2 = por %p844_p1, %p843_p0 }
  0x1e   : > { %756 = vmatprep.subr.bf16.mxu0 %v828_v26 }
  0x1f   : > { %p839_p13 = pneg %p838_p12 }
  0x21   : > { %757 = vmatpush3.bf16.msra.mxu0 %v829_v27  ;;  %p846_p3 = pnand %p845_p2, %p839_p13 }
  0x22   : > { %758 = vmatprep.subr.bf16.mxu0 %v830_v28 }
  0x25   : > { %759 = vmatpush3.bf16.msra.mxu0 %v831_v29 }
  0x26   : > { %760 = vmatprep.subr.bf16.mxu0 %v832_v30 }
  0x29   : > { %761 = vmatpush3.bf16.msra.mxu0 %v833_v31 }
  0x2a   : > { %762 = vmatprep.subr.bf16.mxu0 %v834_v32 }
  0x2d   : > { %763 = vmatpush3.bf16.msra.mxu0 %v835_v33 }
  0x99   : > { %v299_v16 = vpop.permute.xlu0 %298 }
  0x9a   : > { %vm300_vm1 = vcmp.eq.s32.totalorder %v296_v15, %v299_v16 }
  0x9b   : > { %v717_v18 = vsel %vm300_vm1, 1.0, %v901_v17 }
  0x9c   : > { %v303_v20 = vpack.c.bf16 %v717_v18, %v717_v18 }
  0x9e   : > { %721 = vmatmul.mubr.msk.bf16.vlgmr.msra.gmra.mrb[0].mxu1 %vm314_vm2, %v303_v20 }
  0x9f   : > { %391 = vmatpush1.bf16.msra.mxu1 %v814_v19  ;;  %422 = vmatprep.mubr.bf16.mxu1 %v900_v1 }
  0xa0   : > { %392 = vmatprep.subr.bf16.mxu1 %v819_v21 }
  0xa3   : > { %393 = vmatpush1.bf16.msra.mxu1 %v817_v23 }
  0xa6   : > { %726 = vmatmul.mubr.msk.bf16.vlgmr.msra.gmra.mrb[4].mxu1 %vm386_vm3, %v293_v24 }
 0x171   : > { %v359_v35 = vpop.f32.mrb[0].mxu1 }
 0x172   : > { %v361_v36 = vpop.f32.mrb[1].mxu1 }
 0x173   : > { %v363_v37 = vpop.f32.mrb[2].mxu1 }
 0x174   : > { %v364_v38 = vpop.f32.mrb[3].mxu1 }
 0x179   : > { %v424_v43 = vpop.f32.mrb[4].mxu1 }
 0x17a   : > { %v425_v45 = vadd.f32 %v424_v43, %v359_v35  ;;  %v426_v46 = vpop.f32.mrb[5].mxu1 }
 0x17b   : > { %v427_v47 = vadd.f32 %v426_v46, %v361_v36  ;;  %v428_v48 = vpop.f32.mrb[6].mxu1 }
 0x17c   : > { %v443_v49 = vadd.f32 %v436_v42, %v425_v45  ;;  %v429_v50 = vpop.f32.mrb[7].mxu1 }
 0x17d   : > { %v444_v51 = vadd.f32 %v440_v44, %v427_v47 }
 0x17e   : > { %v445_v52 = vmax.f32 %v443_v49, 0.0 }
 0x17f   : > { %v446_v53 = vmax.f32 %v444_v51, 0.0 }
 0x180   : > { %v447_v55 = vpack.c.bf16 %v445_v52, %v445_v52 }
 0x181   : > { %v448_v54 = vpack.c.bf16 %v446_v53, %v446_v53 }
 0x183   : > { %616 = vmatprep.mubr.bf16.mxu0 %v448_v54 }
 0x184   : > { %617 = vmatmul.mubr.bf16.vlgmr.msra.gmra.mrb[0].mxu0 %v447_v55 }
 0x257   : > { %v764_v56 = vpop.f32.mrb[0].mxu0 }
 0x258   : > { %v765_v58 = vpop.f32.mrb[1].mxu0 }
 0x259   : > { %v766_v59 = vadd.f32 %v765_v58, %v764_v56  ;;  %v767_v60 = vpop.f32.mrb[2].mxu0 }
 0x25a   : > { %v768_v61 = vpop.f32.mrb[3].mxu0 }
 0x25b   : > { %v619_v62 = vadd.f32 %v766_v59, %v727_v57 }
 0x25d   : > { %624 = vst.msk [vmem:[%s282_s18] sm:$0xff] %vm386_vm3, %v619_v62 }
 0x25e   : > { %849 = shalt.err (!%p846_p3)
}
 0x25f   : > { %s850_s8 = scalar_lea.hbm %s1081_s16, 128  ;;  %s854_s14 = scalar_lea.hbm %s1131_s7, 256 }
 0x260   : > { %p851_p4 = scmp.ne.s32.totalorder %s1081_s16, %s850_s8  ;;  %p855_p9 = scmp.lt.u32.totalorder %s1081_s16, %s1131_s7 }
 0x261   : > { %p856_p10 = scmp.lt.u32.totalorder %s854_s14, %s850_s8  ;;  %p858_p12 = scmp.lt.u32.totalorder %s850_s8, %s1081_s16 }
 0x262   : > { %p852_p7 = pnand %p851_p4, %p981_p5 }
 0x263   : > { %p857_p11 = por %p856_p10, %p855_p9 }
 0x264   : > { %p853_p8 = pneg %p852_p7 }
 0x265   : > { %p859_p13 = por %p858_p12, %p857_p11 }
 0x267   : > { %p860_p0 = pnand %p859_p13, %p853_p8 }
 0x269   : > { %863 = shalt.err (!%p860_p0)
}
 0x26a   : > { %770 = dma.vmem_to_hbm [thread:$0]  (%p981_p5), %s1083_s19, 128, %s1081_s16, %s626_s21  }
 0x26b PF: > { %p776_p1 = scmp.ge.s32.totalorder %s898_s27, 2  ;;  %s651_s20 = sand.u32 1, %s886_s24  }
 0x26c   : > { %s652_s15 = scalar_lea.sflag [#allocation3], %s651_s20 }
 0x26d   : > { %p773_p2 = pnand %p776_p1, %p985_p6 }
 0x26f   : > { %881 = dma.done.wait (!%p773_p2), %s652_s15, 128  }
 0x270   : > { %883 = vsyncadd (!%p773_p2), %s652_s15, 4294967168  ;;  %p17_p3 = scmp.ge.s32.totalorder %s968_s30, 4   ;;  %s1134_s24 = smov %s890_s25 }
 0x271   : > { %s1135_s25 = smov %s894_s26  ;;  %s1136_s26 = smov %s979_s10 }
 0x272   : > { %s1137_s27 = smov %s968_s30  ;;  %19 = sbr.rel (!%p17_p3) target bundleno = 3 (0x3), region = 86 }
 0x279   :  { %657 = vsyncpa [#allocation3], 1 }
 0x27a   :  { %659 = vsyncpa [#allocation3 + $0x1], 1 }

</bundles_post_ra>
